<compile_context>
chip_gen: v6e
topology: v6e:2x2x1
jax: 0.10.0
libtpu: 0.0.40
codegen_flags: <defaults>
</compile_context>

<pallas_src>
import functools
import math

import jax
import jax.numpy as jnp
from jax import lax
from jax.experimental import pallas as pl
from jax.experimental.pallas import tpu as pltpu

_LANES = 128
_SUBLANES = 8
_NCORES = 2          # outer "parallel" grid axis: 2 TCs on v7x, serial on v5e/v6e
_PAD_NEG = -1e30     # exp(_PAD_NEG) == 0.0 in f32


def _round_up(x, m):
    return ((x + m - 1) // m) * m


def _cdiv(a, b):
    return (a + b - 1) // b


def _infonce_partial_kernel(x_ref, y_ref, num_ref, den_ref, *, rows, tm,
                            blocks_per_core):
    c = pl.program_id(0)
    j = pl.program_id(1)

    # Output blocks are resident across the (arbitrary) reduction axis;
    # zero them on the first step of each core's sweep.
    @pl.when(j == 0)
    def _():
        num_ref[...] = jnp.zeros_like(num_ref)
        den_ref[...] = jnp.zeros_like(den_ref)

    gid = c * blocks_per_core + j          # global row-block id
    row_rem = rows - gid * tm              # valid rows in this block (may be <=0)

    sub = tm // _SUBLANES
    # Native dtype streamed from HBM; cast to f32 in-kernel (free VPU op).
    # (tm,128) -> (tm//8, 8, 128): axis-0 sum below = pure VPU vreg adds
    # (no XLU), accumulated into (8,128) per-lane partials (better precision).
    x = x_ref[...].astype(jnp.float32).reshape(sub, _SUBLANES, _LANES)
    y = y_ref[...].astype(jnp.float32).reshape(sub, _SUBLANES, _LANES)

    def accumulate(xv, yv):
        e = jnp.exp(xv)                    # EUP slot
        num_ref[...] += jnp.sum(e * yv, axis=0)
        den_ref[...] += jnp.sum(e, axis=0)

    # Fast path: full block, no masking cost.
    @pl.when(row_rem >= tm)
    def _():
        accumulate(x, y)

    # Slow path: partial last block of a core, or phantom block of the 2-core
    # split (row_rem <= 0).  Mask invalid rows so garbage from the overhanging
    # block read contributes exactly zero to numerator and denominator.
    @pl.when(row_rem < tm)
    def _():
        shape = (sub, _SUBLANES, _LANES)
        ridx = (lax.broadcasted_iota(jnp.int32, shape, 0) * _SUBLANES
                + lax.broadcasted_iota(jnp.int32, shape, 1))
        mask = ridx < row_rem
        accumulate(jnp.where(mask, x, _PAD_NEG),   # exp -> 0
                   jnp.where(mask, y, 0.0))


@functools.partial(jax.jit, static_argnames=("tile_rows",))
def infonce_loss(inp, label, *, tile_rows=4096):
    assert inp.shape == label.shape
    total = math.prod(inp.shape)

    # Stream native dtypes; reshape(-1) is free for default layouts.
    x = inp.reshape(-1)
    y = label.reshape(-1)

    lane_pad = (-total) % _LANES
    if lane_pad:
        # Rare ragged case (total not a multiple of 128): pad to next lane
        # multiple.  TODO(synk): in-kernel 1D masked tail to remove this copy.
        x = jnp.pad(x, (0, lane_pad), constant_values=_PAD_NEG)  # exp -> 0
        y = jnp.pad(y, (0, lane_pad), constant_values=0)
    rows = (total + lane_pad) // _LANES

    # Tile: multiple of 32 rows (safe for f32 / bf16 / int8 sublane packing),
    # clamped for small inputs.  Row raggedness handled in-kernel.
    tm = min(_round_up(tile_rows, 32), _round_up(rows, 32))
    n_row_blocks = _cdiv(rows, tm)
    blocks_per_core = _cdiv(n_row_blocks, _NCORES)

    x2 = x.reshape(rows, _LANES)
    y2 = y.reshape(rows, _LANES)

    kernel = functools.partial(
        _infonce_partial_kernel,
        rows=rows, tm=tm, blocks_per_core=blocks_per_core)

    # Contiguous per-core halves (DMA friendly); clamp so phantom blocks of the
    # 2-core split never issue an out-of-range block index (kernel masks them).
    def idx(c, j):
        return (jnp.minimum(c * blocks_per_core + j, n_row_blocks - 1), 0)

    part_shape = jax.ShapeDtypeStruct((_NCORES * _SUBLANES, _LANES), jnp.float32)

    pnum, pden = pl.pallas_call(
        kernel,
        out_shape=(part_shape, part_shape),
        grid_spec=pltpu.PrefetchScalarGridSpec(
            num_scalar_prefetch=0,
            grid=(_NCORES, blocks_per_core),
            in_specs=[
                pl.BlockSpec((tm, _LANES), idx),
                pl.BlockSpec((tm, _LANES), idx),
            ],
            out_specs=[
                pl.BlockSpec((_SUBLANES, _LANES), lambda c, j: (c, 0)),
                pl.BlockSpec((_SUBLANES, _LANES), lambda c, j: (c, 0)),
            ],
        ),
        compiler_params=pltpu.CompilerParams(
            # TODO(synk): on v7x verify megacore sharding; else CORE_PARALLEL.
            dimension_semantics=("parallel", "arbitrary"),
            vmem_limit_bytes=32 * 1024 * 1024,
        ),
    )(x2, y2)

    # Tiny final combine (2*8*128 f32 partials each) + -log in plain JAX.
    numerator = jnp.sum(pnum)
    denominator = jnp.sum(pden)
    return -jnp.log(numerator / denominator)


if __name__ == "__main__":
    key = jax.random.PRNGKey(0)
    k_x, k_y = jax.random.split(key)

    # small NCHW inputs: batch=2, channels=4, spatial=16
    x = jax.random.normal(k_x, (2, 4, 16, 16), dtype=jnp.float32)
    label = (jax.random.uniform(k_y, (2, 4, 16, 16)) < 0.1).astype(jnp.float32)
    label = label.at[0, 0, 0, 0].set(1.0)  # ensure numerator > 0

    loss = infonce_loss(x, label)
    jax.block_until_ready(loss)

    e = jnp.exp(x)
    ref = -jnp.log(jnp.sum(e * label) / jnp.sum(e))
    assert jnp.allclose(loss, ref, rtol=1e-5, atol=1e-5), (loss, ref)

    # also exercise the ragged path (total elements not a multiple of 128)
    x_odd = jax.random.normal(k_x, (2, 3, 7, 5), dtype=jnp.float32)
    lbl_odd = (jax.random.uniform(k_y, (2, 3, 7, 5)) < 0.2).astype(jnp.float32)
    lbl_odd = lbl_odd.at[0, 0, 0, 0].set(1.0)
    loss_odd = infonce_loss(x_odd, lbl_odd)
    jax.block_until_ready(loss_odd)
    e_odd = jnp.exp(x_odd)
    ref_odd = -jnp.log(jnp.sum(e_odd * lbl_odd) / jnp.sum(e_odd))
    assert jnp.allclose(loss_odd, ref_odd, rtol=1e-5, atol=1e-5), (loss_odd, ref_odd)

    # bf16 input streamed natively (halves the dominant HBM stream)
    x_bf = x.astype(jnp.bfloat16)
    loss_bf = infonce_loss(x_bf, label)
    jax.block_until_ready(loss_bf)
    e_bf = jnp.exp(x_bf.astype(jnp.float32))
    ref_bf = -jnp.log(jnp.sum(e_bf * label) / jnp.sum(e_bf))
    assert jnp.allclose(loss_bf, ref_bf, rtol=1e-3, atol=1e-3), (loss_bf, ref_bf)

    print("KERNEL_OK")
</pallas_src>

<mosaic_0001>
module attributes {stable_mosaic.version = 11 : i64} {
  func.func @_infonce_partial_kernel(%arg0: i32, %arg1: i32, %arg2: memref<32x128xf32, #tpu.memory_space<vmem>>, %arg3: memref<32x128xf32, #tpu.memory_space<vmem>>, %arg4: memref<8x128xf32, #tpu.memory_space<vmem>>, %arg5: memref<8x128xf32, #tpu.memory_space<vmem>>) attributes {dimension_semantics = [#tpu.dimension_semantics<parallel>, #tpu.dimension_semantics<arbitrary>], iteration_bounds = array<i64: 2, 1>, scalar_prefetch = 0 : i64, scratch_operands = 0 : i64, tpu.core_type = #tpu.core_type<tc>, window_params = [{transform_indices = @transform_0, window_bounds = array<i64: 32, 128>}, {transform_indices = @transform_1, window_bounds = array<i64: 32, 128>}, {transform_indices = @transform_2, window_bounds = array<i64: 8, 128>}, {transform_indices = @transform_3, window_bounds = array<i64: 8, 128>}]} {
    %c0_i32 = arith.constant 0 : i32
    %0 = arith.cmpi eq, %arg1, %c0_i32 : i32
    %1 = arith.extui %0 : i1 to i32
    %c0_i32_0 = arith.constant 0 : i32
    %2 = arith.cmpi ne, %1, %c0_i32_0 : i32
    scf.if %2 {
      %cst = arith.constant 0.000000e+00 : f32
      %17 = vector.broadcast %cst : f32 to vector<8x128xf32>
      %c0_8 = arith.constant 0 : index
      %c0_9 = arith.constant 0 : index
      %18 = vector.load %arg4[%c0_8, %c0_9] : memref<8x128xf32, #tpu.memory_space<vmem>>, vector<8x128xf32>
      tpu.vector_store %arg4[%c0_8, %c0_9], %17 {strides = array<i32>} : memref<8x128xf32, #tpu.memory_space<vmem>>, vector<8x128xf32>,
      %cst_10 = arith.constant 0.000000e+00 : f32
      %19 = vector.broadcast %cst_10 : f32 to vector<8x128xf32>
      %c0_11 = arith.constant 0 : index
      %c0_12 = arith.constant 0 : index
      %20 = vector.load %arg5[%c0_11, %c0_12] : memref<8x128xf32, #tpu.memory_space<vmem>>, vector<8x128xf32>
      tpu.vector_store %arg5[%c0_11, %c0_12], %19 {strides = array<i32>} : memref<8x128xf32, #tpu.memory_space<vmem>>, vector<8x128xf32>,
    } else {
    }
    %c1_i32 = arith.constant 1 : i32
    %3 = arith.muli %arg0, %c1_i32 : i32
    %4 = arith.addi %3, %arg1 : i32
    %c32_i32 = arith.constant 32 : i32
    %5 = arith.muli %4, %c32_i32 : i32
    %c16_i32 = arith.constant 16 : i32
    %6 = arith.subi %c16_i32, %5 : i32
    %c0 = arith.constant 0 : index
    %c0_1 = arith.constant 0 : index
    %7 = vector.load %arg2[%c0, %c0_1] : memref<32x128xf32, #tpu.memory_space<vmem>>, vector<32x128xf32>
    %8 = vector.shape_cast %7 : vector<32x128xf32> to vector<4x8x128xf32>
    %c0_2 = arith.constant 0 : index
    %c0_3 = arith.constant 0 : index
    %9 = vector.load %arg3[%c0_2, %c0_3] : memref<32x128xf32, #tpu.memory_space<vmem>>, vector<32x128xf32>
    %10 = vector.shape_cast %9 : vector<32x128xf32> to vector<4x8x128xf32>
    %c32_i32_4 = arith.constant 32 : i32
    %11 = arith.cmpi sge, %6, %c32_i32_4 : i32
    %12 = arith.extui %11 : i1 to i32
    %c0_i32_5 = arith.constant 0 : i32
    %13 = arith.cmpi ne, %12, %c0_i32_5 : i32
    scf.if %13 {
      %17 = math.exp %8 : vector<4x8x128xf32>
      %c0_8 = arith.constant 0 : index
      %c0_9 = arith.constant 0 : index
      %18 = vector.load %arg4[%c0_8, %c0_9] : memref<8x128xf32, #tpu.memory_space<vmem>>, vector<8x128xf32>
      %19 = arith.mulf %17, %10 : vector<4x8x128xf32>
      %cst = arith.constant dense<0.000000e+00> : vector<8x128xf32>
      %20 = vector.multi_reduction <add>, %19, %cst [0] : vector<4x8x128xf32> to vector<8x128xf32>
      %21 = arith.addf %18, %20 : vector<8x128xf32>
      %c0_10 = arith.constant 0 : index
      %c0_11 = arith.constant 0 : index
      %22 = vector.load %arg4[%c0_10, %c0_11] : memref<8x128xf32, #tpu.memory_space<vmem>>, vector<8x128xf32>
      tpu.vector_store %arg4[%c0_10, %c0_11], %21 {strides = array<i32>} : memref<8x128xf32, #tpu.memory_space<vmem>>, vector<8x128xf32>,
      %c0_12 = arith.constant 0 : index
      %c0_13 = arith.constant 0 : index
      %23 = vector.load %arg5[%c0_12, %c0_13] : memref<8x128xf32, #tpu.memory_space<vmem>>, vector<8x128xf32>
      %cst_14 = arith.constant dense<0.000000e+00> : vector<8x128xf32>
      %24 = vector.multi_reduction <add>, %17, %cst_14 [0] : vector<4x8x128xf32> to vector<8x128xf32>
      %25 = arith.addf %23, %24 : vector<8x128xf32>
      %c0_15 = arith.constant 0 : index
      %c0_16 = arith.constant 0 : index
      %26 = vector.load %arg5[%c0_15, %c0_16] : memref<8x128xf32, #tpu.memory_space<vmem>>, vector<8x128xf32>
      tpu.vector_store %arg5[%c0_15, %c0_16], %25 {strides = array<i32>} : memref<8x128xf32, #tpu.memory_space<vmem>>, vector<8x128xf32>,
    } else {
    }
    %c32_i32_6 = arith.constant 32 : i32
    %14 = arith.cmpi slt, %6, %c32_i32_6 : i32
    %15 = arith.extui %14 : i1 to i32
    %c0_i32_7 = arith.constant 0 : i32
    %16 = arith.cmpi ne, %15, %c0_i32_7 : i32
    scf.if %16 {
      %17 = tpu.iota {dimensions = array<i32: 0>} : vector<4x8x128xi32>
      %c8_i32 = arith.constant 8 : i32
      %18 = vector.broadcast %c8_i32 : i32 to vector<4x8x128xi32>
      %19 = arith.muli %17, %18 : vector<4x8x128xi32>
      %20 = tpu.iota {dimensions = array<i32: 1>} : vector<4x8x128xi32>
      %21 = arith.addi %19, %20 : vector<4x8x128xi32>
      %22 = vector.broadcast %6 : i32 to vector<4x8x128xi32>
      %23 = arith.cmpi slt, %21, %22 : vector<4x8x128xi32>
      %cst = arith.constant -1.000000e+30 : f32
      %24 = vector.broadcast %cst : f32 to vector<4x8x128xf32>
      %25 = arith.select %23, %8, %24 : vector<4x8x128xi1>, vector<4x8x128xf32>
      %cst_8 = arith.constant 0.000000e+00 : f32
      %26 = vector.broadcast %cst_8 : f32 to vector<4x8x128xf32>
      %27 = arith.select %23, %10, %26 : vector<4x8x128xi1>, vector<4x8x128xf32>
      %28 = math.exp %25 : vector<4x8x128xf32>
      %c0_9 = arith.constant 0 : index
      %c0_10 = arith.constant 0 : index
      %29 = vector.load %arg4[%c0_9, %c0_10] : memref<8x128xf32, #tpu.memory_space<vmem>>, vector<8x128xf32>
      %30 = arith.mulf %28, %27 : vector<4x8x128xf32>
      %cst_11 = arith.constant dense<0.000000e+00> : vector<8x128xf32>
      %31 = vector.multi_reduction <add>, %30, %cst_11 [0] : vector<4x8x128xf32> to vector<8x128xf32>
      %32 = arith.addf %29, %31 : vector<8x128xf32>
      %c0_12 = arith.constant 0 : index
      %c0_13 = arith.constant 0 : index
      %33 = vector.load %arg4[%c0_12, %c0_13] : memref<8x128xf32, #tpu.memory_space<vmem>>, vector<8x128xf32>
      tpu.vector_store %arg4[%c0_12, %c0_13], %32 {strides = array<i32>} : memref<8x128xf32, #tpu.memory_space<vmem>>, vector<8x128xf32>,
      %c0_14 = arith.constant 0 : index
      %c0_15 = arith.constant 0 : index
      %34 = vector.load %arg5[%c0_14, %c0_15] : memref<8x128xf32, #tpu.memory_space<vmem>>, vector<8x128xf32>
      %cst_16 = arith.constant dense<0.000000e+00> : vector<8x128xf32>
      %35 = vector.multi_reduction <add>, %28, %cst_16 [0] : vector<4x8x128xf32> to vector<8x128xf32>
      %36 = arith.addf %34, %35 : vector<8x128xf32>
      %c0_17 = arith.constant 0 : index
      %c0_18 = arith.constant 0 : index
      %37 = vector.load %arg5[%c0_17, %c0_18] : memref<8x128xf32, #tpu.memory_space<vmem>>, vector<8x128xf32>
      tpu.vector_store %arg5[%c0_17, %c0_18], %36 {strides = array<i32>} : memref<8x128xf32, #tpu.memory_space<vmem>>, vector<8x128xf32>,
    } else {
    }
    return
  }
  func.func @transform_0(%arg0: i32, %arg1: i32) -> (i32, i32) {
    %c1_i32 = arith.constant 1 : i32
    %0 = arith.muli %arg0, %c1_i32 : i32
    %1 = arith.addi %0, %arg1 : i32
    %c0_i32 = arith.constant 0 : i32
    %2 = arith.minsi %1, %c0_i32 : i32
    %c0_i32_0 = arith.constant 0 : i32
    %c0_i32_1 = arith.constant 0 : i32
    return %2, %c0_i32_0 : i32, i32
  }
  func.func @transform_1(%arg0: i32, %arg1: i32) -> (i32, i32) {
    %c1_i32 = arith.constant 1 : i32
    %0 = arith.muli %arg0, %c1_i32 : i32
    %1 = arith.addi %0, %arg1 : i32
    %c0_i32 = arith.constant 0 : i32
    %2 = arith.minsi %1, %c0_i32 : i32
    %c0_i32_0 = arith.constant 0 : i32
    %c0_i32_1 = arith.constant 0 : i32
    return %2, %c0_i32_0 : i32, i32
  }
  func.func @transform_2(%arg0: i32, %arg1: i32) -> (i32, i32) {
    %c0_i32 = arith.constant 0 : i32
    %c0_i32_0 = arith.constant 0 : i32
    return %arg0, %c0_i32 : i32, i32
  }
  func.func @transform_3(%arg0: i32, %arg1: i32) -> (i32, i32) {
    %c0_i32 = arith.constant 0 : i32
    %c0_i32_0 = arith.constant 0 : i32
    return %arg0, %c0_i32 : i32, i32
  }
}

</mosaic_0001>

<bundles_post_ra>
// kernel: infonce_loss.1
= control target key start
LH: loop header
LB: loop body
LE: loop exit
PB: predicated region body
PF: predicated region fallthrough
CT: control target
= control target key end

     0   :  { %s575_s12 = smov 0   ;;  %s577_s13 = smov 0   ;;  %s641_s0 = inlined_call_operand.vmem [shape: f32[16,128], index: 0, kind: input, shape index: {}]   ;;  %s642_s1 = inlined_call_operand.vmem [shape: f32[16,128], index: 1, kind: input, shape index: {}]   ;;  %s643_s2 = inlined_call_operand.vmem [shape: f32[16,128], index: 2, kind: output, shape index: {0}]   ;;  %s644_s3 = inlined_call_operand.vmem [shape: f32[16,128], index: 3, kind: output, shape index: {1}]  }
   0x1   :  { %s579_s14 = smov 0  }
   0x2 LB: > { %s26_s15 = sadd.s32 1, %s548_s13  ;;  %p477_p0 = scmp.ge.s32.totalorder %s552_s14, 1  ;;  %s552_s14 = sphi %s579_s14, %s14_s14   ;;  %s548_s13 = sphi %s577_s13, %s646_s13   ;;  %s544_s12 = sphi %s575_s12, %s645_s12  }
   0x3   : > { %p28_p1 = scmp.ge.s32.totalorder %s26_s15, 2  ;;  %p196_p2 = scmp.lt.s32.totalorder %s552_s14, 3 }
   0x5   : > { %s648_s15 = smov (%p28_p1, %s26_s15), 0  ;;  %p197_p3 = pnand %p477_p0, %p196_p2 }
   0x6   : > { %p239_p4 = scmp.lt.s32.totalorder (!%p197_p3), %s544_s12, 0  ;;  %p270_p5 = scmp.lt.s32.totalorder (!%p197_p3), %s544_s12, 1 }
   0x7   : > { %200 = sbr.rel (%p197_p3) target bundleno = 93 (0x5d), region = 28  ;;  %s484_s16 = sshll.u32 (!%p197_p3), %s544_s12, 5 }
   0x8   : > { %s593_s19 = ssub.s32 (!%p197_p3), 16, %s484_s16 }
   0x9   : > { %p485_p7 = scmp.lt.s32.totalorder (!%p197_p3), %s593_s19, 32 }
   0xc   : > { %s240_s17 = scalar_select %p239_p4, %s544_s12, 0  ;;  %v554_v0 = vmov 0.0  }
   0xd   : > { %s650_s12 = smov (!%p270_p5, %s544_s12), 1 }
   0xe   : > { %s478_s18 = sshll.u32 %s240_s17, 2  ;;  %s482_s20 = sshll.u32 %s650_s12, 3 }
   0xf   : > { %p244_p6 = scmp.lt.s32.totalorder %s478_s18, 1  ;;  %s598_s23 = scalar_lea.vmem %s643_s2, %s482_s20 }
  0x10   : > { %s603_s26 = scalar_lea.vmem %s644_s3, %s482_s20  ;;  %282 = vst [vmem:[%s598_s23] sm:$0xff] %v554_v0 }
  0x11   : > { %s652_s18 = smov (!%p244_p6, %s478_s18), 1  ;;  %283 = vst [vmem:[%s603_s26] sm:$0xff] %v554_v0 }
  0x12   : > { %s479_s27 = sshll.u32 %s652_s18, 3  ;;  %298 = sbr.rel (%p485_p7) target bundleno = 51 (0x33), region = 36 }
  0x13   : > { %s247_s30 = scalar_lea.vmem %s641_s0, %s479_s27  ;;  %s263_s6 = scalar_lea.vmem %s642_s1, %s479_s27 }
  0x14   : > { %v287_v1 = vld [vmem:[%s247_s30] sm:$0xff]  ;;  %v288_v2 = vld [vmem:[%s247_s30 + $0x8] sm:$0xff]  ;;  %v289_v3 = vld [vmem:[%s247_s30 + $0x10] sm:$0xff] }
  0x15   : > { %v290_v4 = vld [vmem:[%s247_s30 + $0x18] sm:$0xff]  ;;  %v291_v5 = vld [vmem:[%s263_s6] sm:$0xff]  ;;  %v292_v6 = vld [vmem:[%s263_s6 + $0x8] sm:$0xff] }
  0x16   : > { %v293_v7 = vld [vmem:[%s263_s6 + $0x10] sm:$0xff]  ;;  %v294_v8 = vld [vmem:[%s263_s6 + $0x18] sm:$0xff] }
  0x17   : > { %v299_v9 = vmul.f32 1.442695, %v287_v1  ;;  %v301_v10 = vmul.f32 1.442695, %v288_v2  ;;  %v303_v11 = vmul.f32 1.442695, %v289_v3 }
  0x18   : > { %v305_v12 = vmul.f32 1.442695, %v290_v4  ;;  %v317_v24 = vld [vmem:[%s603_s26] sm:$0xff] }
  0x19   : > { %514 = vpow2.f32 %v299_v9  ;;  %v307_v27 = vld [vmem:[%s598_s23] sm:$0xff] }
  0x1a   : > { %516 = vpow2.f32 %v301_v10 }
  0x1b   : > { %518 = vpow2.f32 %v303_v11 }
  0x1c   : > { %520 = vpow2.f32 %v305_v12 }
  0x26   : > { %v515_v13 = vpop.eup %514 }
  0x27   : > { %v517_v14 = vpop.eup %516  ;;  %v308_v15 = vmul.f32 %v515_v13, %v291_v5 }
  0x28   : > { %v519_v16 = vpop.eup %518  ;;  %v309_v17 = vmul.f32 %v517_v14, %v292_v6  ;;  %v318_v18 = vadd.f32 %v517_v14, %v515_v13 }
  0x29   : > { %v521_v19 = vpop.eup %520  ;;  %v310_v20 = vmul.f32 %v519_v16, %v293_v7 }
  0x2a   : > { %v311_v21 = vmul.f32 %v521_v19, %v294_v8  ;;  %v312_v22 = vadd.f32 %v309_v17, %v308_v15  ;;  %v319_v23 = vadd.f32 %v519_v16, %v318_v18 }
  0x2c   : > { %v313_v25 = vadd.f32 %v312_v22, %v310_v20  ;;  %v320_v26 = vadd.f32 %v521_v19, %v319_v23 }
  0x2e   : > { %v314_v28 = vadd.f32 %v313_v25, %v311_v21  ;;  %v321_v29 = vadd.f32 %v320_v26, %v317_v24 }
  0x30   : > { %v315_v30 = vadd.f32 %v314_v28, %v307_v27  ;;  %322 = vst [vmem:[%s603_s26] sm:$0xff] %v321_v29 }
  0x32   : > { %316 = vst [vmem:[%s598_s23] sm:$0xff] %v315_v30 }
  0x33 PF: > { %p486_p8 = scmp.ge.s32.totalorder %s593_s19, 32 }
  0x35   : > { %326 = sbr.rel (%p486_p8) target bundleno = 93 (0x5d), region = 40 }
  0x3a   : > { %v327_v31 = vlaneseq  ;;  %v332_v32 = vstv %s593_s19  ;;  %v363_v60 = vld [vmem:[%s603_s26] sm:$0xff] }
  0x3b   : > { %v353_v63 = vld [vmem:[%s598_s23] sm:$0xff] }
  0x3c   : > { %v328_v33 = vshrl.u32 %v327_v31, 7 }
  0x3e   : > { %v329_v34 = vadd.s32 8, %v328_v33  ;;  %v330_v35 = vadd.s32 16, %v328_v33  ;;  %v331_v36 = vadd.s32 24, %v328_v33  ;;  %vm333_vm0 = vcmp.lt.s32.totalorder %v328_v33, %v332_v32 }
  0x3f   : > { %v337_v37 = vsel %vm333_vm0, %v287_v1, -1e+30  ;;  %v341_v45 = vsel %vm333_vm0, %v291_v5, 0.0 }
  0x40   : > { %vm334_vm1 = vcmp.lt.s32.totalorder %v329_v34, %v332_v32  ;;  %vm335_vm2 = vcmp.lt.s32.totalorder %v330_v35, %v332_v32  ;;  %vm336_vm3 = vcmp.lt.s32.totalorder %v331_v36, %v332_v32  ;;  %v345_v38 = vmul.f32 1.442695, %v337_v37 }
  0x41   : > { %v338_v39 = vsel %vm334_vm1, %v288_v2, -1e+30  ;;  %v339_v40 = vsel %vm335_vm2, %v289_v3, -1e+30  ;;  %v340_v41 = vsel %vm336_vm3, %v290_v4, -1e+30 }
  0x42   : > { %522 = vpow2.f32 %v345_v38  ;;  %v347_v42 = vmul.f32 1.442695, %v338_v39  ;;  %v349_v43 = vmul.f32 1.442695, %v339_v40  ;;  %v351_v44 = vmul.f32 1.442695, %v340_v41 }
  0x43   : > { %v342_v47 = vsel %vm334_vm1, %v292_v6, 0.0  ;;  %v343_v48 = vsel %vm335_vm2, %v293_v7, 0.0  ;;  %v344_v51 = vsel %vm336_vm3, %v294_v8, 0.0 }
  0x44   : > { %524 = vpow2.f32 %v347_v42 }
  0x45   : > { %526 = vpow2.f32 %v349_v43 }
  0x46   : > { %528 = vpow2.f32 %v351_v44 }
  0x4f   : > { %v523_v46 = vpop.eup %522 }
  0x50   : > { %v354_v49 = vmul.f32 %v523_v46, %v341_v45 }
  0x51   : > { %v525_v50 = vpop.eup %524 }
  0x52   : > { %v527_v52 = vpop.eup %526  ;;  %v355_v53 = vmul.f32 %v525_v50, %v342_v47  ;;  %v364_v54 = vadd.f32 %v525_v50, %v523_v46 }
  0x53   : > { %v529_v55 = vpop.eup %528  ;;  %v356_v56 = vmul.f32 %v527_v52, %v343_v48 }
  0x54   : > { %v357_v57 = vmul.f32 %v529_v55, %v344_v51  ;;  %v358_v58 = vadd.f32 %v355_v53, %v354_v49  ;;  %v365_v59 = vadd.f32 %v527_v52, %v364_v54 }
  0x56   : > { %v359_v61 = vadd.f32 %v358_v58, %v356_v56  ;;  %v366_v62 = vadd.f32 %v529_v55, %v365_v59 }
  0x58   : > { %v360_v0 = vadd.f32 %v359_v61, %v357_v57  ;;  %v367_v1 = vadd.f32 %v366_v62, %v363_v60 }
  0x5a   : > { %v361_v2 = vadd.f32 %v360_v0, %v353_v63  ;;  %368 = vst [vmem:[%s603_s26] sm:$0xff] %v367_v1 }
  0x5c   : > { %362 = vst [vmem:[%s598_s23] sm:$0xff] %v361_v2 }
  0x5d PF: > { %s14_s14 = sadd.s32 1, %s552_s14   ;;  %s645_s12 = smov %s548_s13 }
  0x5e   : > { %p11_p9 = scmp.ge.s32.totalorder %s14_s14, 4   ;;  %s646_s13 = smov %s648_s15 }
  0x60   :  { %13 = sbr.rel (!%p11_p9) target bundleno = 2 (0x2), region = 85 }

</bundles_post_ra>
